<compile_context>
chip_gen: v7x
topology: tpu7x:2x2x1
jax: 0.10.0
libtpu: 0.0.40
codegen_flags: <defaults>
</compile_context>

<pallas_src>
import functools

import jax
import jax.numpy as jnp
from jax import lax
from jax.experimental import pallas as pl
from jax.experimental.pallas import tpu as pltpu

HIDDEN_SIZE = [80, 8]

_VMEM_LIMIT_BYTES = 32 * 1024 * 1024   # safe scoped-VMEM window on v5e/v6e/v7x
_VMEM_BLOCK_BUDGET = 24 * 1024 * 1024  # what the kernel's blocks may consume


def _round_up(n, m):
    return ((n + m - 1) // m) * m


def _lane_pad(n):
    # f32 minor dim is padded to 128 lanes in VMEM.
    return _round_up(n, 128)


def mlp_kernel(x_ref, w1_ref, b1_ref, w2_ref, b2_ref, w3_ref, b3_ref, o_ref):
    # (tb, in) x (out, in) -> (tb, out): contract dim 1 of both operands so the
    # PyTorch [out, in] weight layout drives the MXU directly (no transposes).
    dn = (((1,), (1,)), ((), ()))

    x = x_ref[...]                                            # (tb, D_in)

    a1 = lax.dot_general(x, w1_ref[...], dn,
                         preferred_element_type=jnp.float32)  # (tb, H1)
    a1 = jnp.maximum(a1 + b1_ref[...], 0.0)

    a2 = lax.dot_general(a1, w2_ref[...], dn,
                         preferred_element_type=jnp.float32)  # (tb, H2)
    a2 = jnp.maximum(a2 + b2_ref[...], 0.0)

    out = lax.dot_general(a2, w3_ref[...], dn,
                          preferred_element_type=jnp.float32)  # (tb, C)
    o_ref[...] = (out + b3_ref[...]).astype(o_ref.dtype)


def _pick_batch_tile(B, d_in, h1, h2, c, block_b):
    """Largest batch tile (rows, sublane axis) that fits the VMEM budget."""
    # Per-row f32 VMEM footprint, lane-padded to 128:
    #   x block (double-buffered) + out block (double-buffered) + a1 + a2.
    per_row = 4 * (2 * _lane_pad(d_in) + 2 * _lane_pad(c)
                   + _lane_pad(h1) + _lane_pad(h2))
    cap = max(8, (_VMEM_BLOCK_BUDGET // per_row) // 8 * 8)
    tb = max(8, min(block_b, cap) // 8 * 8)
    if B <= tb:
        # Single block: pad only to the 8-row sublane granule.
        return _round_up(max(B, 1), 8)
    return tb


def neural_net_forward(x, params, *, block_b=8192):
    """x: (B, D_in) f32.  params: ((W1,b1),(W2,b2),(W3,b3)), W in PyTorch
    [out, in] layout, b shaped (1, out).  Returns (B, num_classes) f32."""
    (w1, b1), (w2, b2), (w3, b3) = params
    B, d_in = x.shape
    h1, h2, c = w1.shape[0], w2.shape[0], w3.shape[0]

    tb = _pick_batch_tile(B, d_in, h1, h2, c, block_b)
    b_pad = _round_up(B, tb)
    nb = b_pad // tb
    if b_pad != B:
        # Only the (small) remainder rows are padded; for best throughput feed
        # batches that are multiples of the tile so this is a no-op.
        x = jnp.pad(x, ((0, b_pad - B), (0, 0)))

    def resident(a):
        return pl.BlockSpec(a.shape, lambda i: (0,) * a.ndim)

    flops = 2 * B * (d_in * h1 + h1 * h2 + h2 * c)
    bytes_accessed = 4 * (B * d_in + w1.size + b1.size + w2.size + b2.size
                          + w3.size + b3.size + B * c)

    out = pl.pallas_call(
        mlp_kernel,
        out_shape=jax.ShapeDtypeStruct((b_pad, c), jnp.float32),
        grid_spec=pltpu.PrefetchScalarGridSpec(
            num_scalar_prefetch=0,
            grid=(nb,),
            in_specs=[
                pl.BlockSpec((tb, d_in), lambda i: (i, 0)),   # streamed x
                resident(w1), resident(b1),                   # VMEM-resident
                resident(w2), resident(b2),
                resident(w3), resident(b3),
            ],
            out_specs=pl.BlockSpec((tb, c), lambda i: (i, 0)),
        ),
        compiler_params=pltpu.CompilerParams(
            dimension_semantics=("parallel",),        # shards across v7x 2 TCs
            vmem_limit_bytes=_VMEM_LIMIT_BYTES),
        cost_estimate=pl.CostEstimate(
            flops=flops, transcendentals=0, bytes_accessed=bytes_accessed),
    )(x, w1, b1, w2, b2, w3, b3)

    return out[:B] if b_pad != B else out


def init_params(key, input_size, hidden_size, num_classes):
    """Deterministic init mimicking nn.Linear (uniform(-1/sqrt(fan_in), ...)).
    Each layer is (W, b) with W in PyTorch [out, in] layout, b shaped (1, out)."""
    ks = jax.random.split(key, 6)

    def linear(kw, kb, fan_in, fan_out):
        bound = 1.0 / jnp.sqrt(jnp.float32(fan_in))
        w = jax.random.uniform(kw, (fan_out, fan_in), jnp.float32, -bound, bound)
        b = jax.random.uniform(kb, (1, fan_out), jnp.float32, -bound, bound)
        return w, b

    l1 = linear(ks[0], ks[1], input_size, hidden_size[0])
    l2 = linear(ks[2], ks[3], hidden_size[0], hidden_size[1])
    l3 = linear(ks[4], ks[5], hidden_size[1], num_classes)
    return (l1, l2, l3)


def reference_forward(x, params):
    (w1, b1), (w2, b2), (w3, b3) = params
    h = jnp.maximum(x @ w1.T + b1, 0.0)
    h = jnp.maximum(h @ w2.T + b2, 0.0)
    return h @ w3.T + b3


if __name__ == "__main__":
    # Small synthetic shapes consistent with the module:
    # final_data -> [batch, input_size], wastage_output -> [batch, num_classes]
    batch = 8
    input_size = 32
    num_classes = 4

    key = jax.random.PRNGKey(0)
    k_x, k_p, k_x2 = jax.random.split(key, 3)

    x = jax.random.normal(k_x, (batch, input_size), dtype=jnp.float32)
    params = init_params(k_p, input_size, HIDDEN_SIZE, num_classes)

    out = jax.block_until_ready(neural_net_forward(x, params))
    ref = reference_forward(x, params)
    assert out.shape == (batch, num_classes)
    assert jnp.allclose(out, ref, atol=1e-4, rtol=1e-4)

    # Exercise the multi-block (tiled + padded batch) path as well.
    x_big = jax.random.normal(k_x2, (200, input_size), dtype=jnp.float32)
    out_big = jax.block_until_ready(
        neural_net_forward(x_big, params, block_b=64))
    ref_big = reference_forward(x_big, params)
    assert out_big.shape == (200, num_classes)
    assert jnp.allclose(out_big, ref_big, atol=1e-4, rtol=1e-4)

    print("KERNEL_OK")
</pallas_src>

<mosaic_0001>
module attributes {stable_mosaic.version = 11 : i64} {
  func.func @mlp_kernel(%arg0: i32, %arg1: memref<8x32xf32, #tpu.memory_space<vmem>>, %arg2: memref<80x32xf32, #tpu.memory_space<vmem>>, %arg3: memref<1x80xf32, #tpu.memory_space<vmem>>, %arg4: memref<8x80xf32, #tpu.memory_space<vmem>>, %arg5: memref<1x8xf32, #tpu.memory_space<vmem>>, %arg6: memref<4x8xf32, #tpu.memory_space<vmem>>, %arg7: memref<1x4xf32, #tpu.memory_space<vmem>>, %arg8: memref<8x4xf32, #tpu.memory_space<vmem>>) attributes {dimension_semantics = [#tpu.dimension_semantics<parallel>], iteration_bounds = array<i64: 1>, scalar_prefetch = 0 : i64, scratch_operands = 0 : i64, tpu.core_type = #tpu.core_type<tc>, window_params = [{transform_indices = @transform_0, window_bounds = array<i64: 8, 32>}, {pipeline_mode = #tpu.pipeline_mode<synchronous>, transform_indices = @transform_1, window_bounds = array<i64: 80, 32>}, {pipeline_mode = #tpu.pipeline_mode<synchronous>, transform_indices = @transform_2, window_bounds = array<i64: 1, 80>}, {pipeline_mode = #tpu.pipeline_mode<synchronous>, transform_indices = @transform_3, window_bounds = array<i64: 8, 80>}, {pipeline_mode = #tpu.pipeline_mode<synchronous>, transform_indices = @transform_4, window_bounds = array<i64: 1, 8>}, {pipeline_mode = #tpu.pipeline_mode<synchronous>, transform_indices = @transform_5, window_bounds = array<i64: 4, 8>}, {pipeline_mode = #tpu.pipeline_mode<synchronous>, transform_indices = @transform_6, window_bounds = array<i64: 1, 4>}, {transform_indices = @transform_7, window_bounds = array<i64: 8, 4>}]} {
    %c0 = arith.constant 0 : index
    %c0_0 = arith.constant 0 : index
    %0 = vector.load %arg1[%c0, %c0_0] : memref<8x32xf32, #tpu.memory_space<vmem>>, vector<8x32xf32>
    %c0_1 = arith.constant 0 : index
    %c0_2 = arith.constant 0 : index
    %1 = vector.load %arg2[%c0_1, %c0_2] : memref<80x32xf32, #tpu.memory_space<vmem>>, vector<80x32xf32>
    %cst = arith.constant dense<0.000000e+00> : vector<8x80xf32>
    %2 = tpu.matmul %0, %1, %cst {dimension_numbers = #tpu.dot_dimension_numbers<[1], [1], [0], [0], [0, 0, 1, 0], [], []>} : vector<8x32xf32>, vector<80x32xf32>, vector<8x80xf32> -> vector<8x80xf32>
    %c0_3 = arith.constant 0 : index
    %c0_4 = arith.constant 0 : index
    %3 = vector.load %arg3[%c0_3, %c0_4] : memref<1x80xf32, #tpu.memory_space<vmem>>, vector<1x80xf32>
    %4 = vector.broadcast %3 : vector<1x80xf32> to vector<8x80xf32>
    %5 = arith.addf %2, %4 : vector<8x80xf32>
    %cst_5 = arith.constant 0.000000e+00 : f32
    %6 = vector.broadcast %cst_5 : f32 to vector<8x80xf32>
    %7 = arith.maximumf %5, %6 : vector<8x80xf32>
    %c0_6 = arith.constant 0 : index
    %c0_7 = arith.constant 0 : index
    %8 = vector.load %arg4[%c0_6, %c0_7] : memref<8x80xf32, #tpu.memory_space<vmem>>, vector<8x80xf32>
    %cst_8 = arith.constant dense<0.000000e+00> : vector<8x8xf32>
    %9 = tpu.matmul %7, %8, %cst_8 {dimension_numbers = #tpu.dot_dimension_numbers<[1], [1], [0], [0], [0, 0, 1, 0], [], []>} : vector<8x80xf32>, vector<8x80xf32>, vector<8x8xf32> -> vector<8x8xf32>
    %c0_9 = arith.constant 0 : index
    %c0_10 = arith.constant 0 : index
    %10 = vector.load %arg5[%c0_9, %c0_10] : memref<1x8xf32, #tpu.memory_space<vmem>>, vector<1x8xf32>
    %11 = vector.broadcast %10 : vector<1x8xf32> to vector<8x8xf32>
    %12 = arith.addf %9, %11 : vector<8x8xf32>
    %cst_11 = arith.constant 0.000000e+00 : f32
    %13 = vector.broadcast %cst_11 : f32 to vector<8x8xf32>
    %14 = arith.maximumf %12, %13 : vector<8x8xf32>
    %c0_12 = arith.constant 0 : index
    %c0_13 = arith.constant 0 : index
    %15 = vector.load %arg6[%c0_12, %c0_13] : memref<4x8xf32, #tpu.memory_space<vmem>>, vector<4x8xf32>
    %cst_14 = arith.constant dense<0.000000e+00> : vector<8x4xf32>
    %16 = tpu.matmul %14, %15, %cst_14 {dimension_numbers = #tpu.dot_dimension_numbers<[1], [1], [0], [0], [0, 0, 1, 0], [], []>} : vector<8x8xf32>, vector<4x8xf32>, vector<8x4xf32> -> vector<8x4xf32>
    %c0_15 = arith.constant 0 : index
    %c0_16 = arith.constant 0 : index
    %17 = vector.load %arg7[%c0_15, %c0_16] : memref<1x4xf32, #tpu.memory_space<vmem>>, vector<1x4xf32>
    %18 = vector.broadcast %17 : vector<1x4xf32> to vector<8x4xf32>
    %19 = arith.addf %16, %18 : vector<8x4xf32>
    %c0_17 = arith.constant 0 : index
    %c0_18 = arith.constant 0 : index
    %20 = vector.load %arg8[%c0_17, %c0_18] : memref<8x4xf32, #tpu.memory_space<vmem>>, vector<8x4xf32>
    tpu.vector_store %arg8[%c0_17, %c0_18], %19 {strides = array<i32>} : memref<8x4xf32, #tpu.memory_space<vmem>>, vector<8x4xf32>,
    return
  }
  func.func @transform_0(%arg0: i32) -> (i32, i32) {
    %c0_i32 = arith.constant 0 : i32
    %c0_i32_0 = arith.constant 0 : i32
    return %arg0, %c0_i32 : i32, i32
  }
  func.func @transform_1(%arg0: i32) -> (i32, i32) {
    %c0_i32 = arith.constant 0 : i32
    %c0_i32_0 = arith.constant 0 : i32
    %c0_i32_1 = arith.constant 0 : i32
    return %c0_i32, %c0_i32_0 : i32, i32
  }
  func.func @transform_2(%arg0: i32) -> (i32, i32) {
    %c0_i32 = arith.constant 0 : i32
    %c0_i32_0 = arith.constant 0 : i32
    %c0_i32_1 = arith.constant 0 : i32
    return %c0_i32, %c0_i32_0 : i32, i32
  }
  func.func @transform_3(%arg0: i32) -> (i32, i32) {
    %c0_i32 = arith.constant 0 : i32
    %c0_i32_0 = arith.constant 0 : i32
    %c0_i32_1 = arith.constant 0 : i32
    return %c0_i32, %c0_i32_0 : i32, i32
  }
  func.func @transform_4(%arg0: i32) -> (i32, i32) {
    %c0_i32 = arith.constant 0 : i32
    %c0_i32_0 = arith.constant 0 : i32
    %c0_i32_1 = arith.constant 0 : i32
    return %c0_i32, %c0_i32_0 : i32, i32
  }
  func.func @transform_5(%arg0: i32) -> (i32, i32) {
    %c0_i32 = arith.constant 0 : i32
    %c0_i32_0 = arith.constant 0 : i32
    %c0_i32_1 = arith.constant 0 : i32
    return %c0_i32, %c0_i32_0 : i32, i32
  }
  func.func @transform_6(%arg0: i32) -> (i32, i32) {
    %c0_i32 = arith.constant 0 : i32
    %c0_i32_0 = arith.constant 0 : i32
    %c0_i32_1 = arith.constant 0 : i32
    return %c0_i32, %c0_i32_0 : i32, i32
  }
  func.func @transform_7(%arg0: i32) -> (i32, i32) {
    %c0_i32 = arith.constant 0 : i32
    %c0_i32_0 = arith.constant 0 : i32
    return %arg0, %c0_i32 : i32, i32
  }
}

</mosaic_0001>

<bundles_post_ra>
// kernel: tpu_custom_call.1
= control target key start
LH: loop header
LB: loop body
LE: loop exit
PB: predicated region body
PF: predicated region fallthrough
CT: control target
= control target key end

     0   :  { %vm44_vm0 = vcmask 261120   ;;  %v415_v0 = vmov 0.0|0.0   ;;  %vm416_vm2 = vmmov 0   ;;  %v417_v4 = vmov 0.0   ;;  %s529_s1 = inlined_call_operand.vmem [shape: f32[80,32], index: 1, kind: input, shape index: {}]   ;;  %s530_s0 = inlined_call_operand.vmem [shape: f32[8,32], index: 0, kind: input, shape index: {}]   ;;  %s531_s3 = inlined_call_operand.vmem [shape: f32[8,80], index: 3, kind: input, shape index: {}]   ;;  %s532_s2 = inlined_call_operand.vmem [shape: f32[1,80], index: 2, kind: input, shape index: {}]   ;;  %s533_s5 = inlined_call_operand.vmem [shape: f32[4,8], index: 5, kind: input, shape index: {}]   ;;  %s534_s4 = inlined_call_operand.vmem [shape: f32[1,8], index: 4, kind: input, shape index: {}]   ;;  %s535_s6 = inlined_call_operand.vmem [shape: f32[1,4], index: 6, kind: input, shape index: {}]   ;;  %s536_s7 = inlined_call_operand.vmem [shape: f32[8,4], index: 7, kind: output, shape index: {}]  }
   0x1   :  { %392 = vmatprep.subr.bf16.mxu0 %v415_v0  ;;  %v27_v1 = vld [vmem:[%s529_s1] sm:$0xff]  ;;  %v28_v2 = vld [vmem:[%s529_s1 + $0x8] sm:$0xff]  ;;  %vm466_vm1 = vmpackc.low %vm44_vm0, %vm44_vm0  ;;  %379 = vmatprep.mubr.msk.f32.mxu0 %vm416_vm2, %v417_v4  ;;  %vm157_vm3 = vcmask 654336   ;;  %vm243_vm4 = vcmask 64512   ;;  %vm320_vm5 = vcmask 31744  }
   0x2   :  { %v393_v5 = vpack.c.bf16 %v28_v2, %v27_v1  ;;  %382 = vmatprep.subr.mxu1 %v417_v4  ;;  %384 = vmatprep.mubr.msk.f32.mxu1 %vm416_vm2, %v417_v4  ;;  %v29_v6 = vld [vmem:[%s529_s1 + $0x10] sm:$0xff]  ;;  %v30_v7 = vld [vmem:[%s529_s1 + $0x18] sm:$0xff]  ;;  %v31_v9 = vld [vmem:[%s529_s1 + $0x20] sm:$0xff] }
   0x3   :  { %v397_v8 = vpack.c.bf16 %v30_v7, %v29_v6  ;;  %v32_v10 = vld [vmem:[%s529_s1 + $0x28] sm:$0xff]  ;;  %v33_v12 = vld [vmem:[%s529_s1 + $0x30] sm:$0xff]  ;;  %v34_v13 = vld [vmem:[%s529_s1 + $0x38] sm:$0xff] }
   0x4   :  { %395 = vmatpush3.bf16.xpose.msk.msra.mxu0 %vm466_vm1, %v393_v5  ;;  %v401_v11 = vpack.c.bf16 %v32_v10, %v31_v9  ;;  %v405_v14 = vpack.c.bf16 %v34_v13, %v33_v12  ;;  %v35_v15 = vld [vmem:[%s529_s1 + $0x40] sm:$0xff]  ;;  %v36_v16 = vld [vmem:[%s529_s1 + $0x48] sm:$0xff] }
   0x5   :  { %396 = vmatprep.subr.bf16.mxu0 %v415_v0  ;;  %v409_v17 = vpack.c.bf16 %v36_v16, %v35_v15  ;;  %v26_v18 = vld [vmem:[%s530_s0] sm:$0xff] }
   0x6   :  { %v149_v19 = vld [vmem:[%s531_s3] sm:$0xff] }
   0x7   :  { %383 = vmatpush3.xpose.msk.msra.mxu1 %vm157_vm3, %v149_v19  ;;  %v326_v20 = vld [vmem:[%s532_s2] ss:$0 sm:$0xff] }
   0x8   :  { %387 = vmatprep.subr.mxu1 %v417_v4  ;;  %v235_v25 = vld [vmem:[%s533_s5] sm:$0xf] }
   0x9   :  { %v338_v26 = vld [vmem:[%s534_s4] ss:$0 sm:$0xff] }
   0xa   :  { %v341_v31 = vld [vmem:[%s535_s6] ss:$0 sm:$0xff] }
   0xc   :  { %399 = vmatpush3.bf16.xpose.msk.msra.mxu0 %vm466_vm1, %v397_v8 }
   0xd   :  { %400 = vmatprep.subr.bf16.mxu0 %v415_v0 }
  0x14   :  { %403 = vmatpush3.bf16.xpose.msk.msra.mxu0 %vm466_vm1, %v401_v11 }
  0x15   :  { %404 = vmatprep.subr.bf16.mxu0 %v415_v0 }
  0x1c   :  { %407 = vmatpush3.bf16.xpose.msk.msra.mxu0 %vm466_vm1, %v405_v14 }
  0x1d   :  { %408 = vmatprep.subr.bf16.mxu0 %v415_v0 }
  0x24   :  { %411 = vmatpush3.bf16.xpose.msk.msra.mxu0 %vm466_vm1, %v409_v17 }
  0x2b   :  { %380 = vmatmul.mubr.msk.f32.vlgmr.msra.gmra.mrb[0].mxu0 %vm44_vm0, %v26_v18 }
  0xfe   :  { %v144_v21 = vpop.f32.mrb[0].mxu0 }
  0xff   :  { %v145_v22 = vadd.f32 %v326_v20, %v144_v21  ;;  %v381_v23 = vpop.f32.mrb[1].mxu0 }
 0x101   :  { %v148_v24 = vmax.f32 %v145_v22, 0.0 }
 0x103   :  { %385 = vmatmul.mubr.msk.f32.vlgmr.msra.gmra.mrb[0].mxu1 %vm157_vm3, %v148_v24 }
 0x104   :  { %389 = vmatprep.mubr.msk.f32.mxu1 %vm416_vm2, %v417_v4  ;;  %388 = vmatpush3.xpose.msk.msra.mxu1 %vm243_vm4, %v235_v25 }
 0x1d6   :  { %v230_v27 = vpop.f32.mrb[0].mxu1 }
 0x1d7   :  { %v231_v28 = vadd.f32 %v338_v26, %v230_v27  ;;  %v386_v29 = vpop.f32.mrb[1].mxu1 }
 0x1d9   :  { %v234_v30 = vmax.f32 %v231_v28, 0.0 }
 0x1db   :  { %390 = vmatmul.mubr.msk.f32.vlgmr.msra.gmra.mrb[2].mxu1 %vm243_vm4, %v234_v30 }
 0x2ae   :  { %v316_v32 = vpop.f32.mrb[2].mxu1 }
 0x2af   :  { %v317_v33 = vadd.f32 %v341_v31, %v316_v32  ;;  %v391_v34 = vpop.f32.mrb[3].mxu1 }
 0x2b1   :  { %321 = vst.msk [vmem:[%s536_s7] sm:$0xff] %vm320_vm5, %v317_v33 }

</bundles_post_ra>
